<compile_context>
chip_gen: v6e
topology: v6e:2x2x1
jax: 0.10.0
libtpu: 0.0.40
codegen_flags: <defaults>
</compile_context>

<pallas_src>
import jax
import jax.numpy as jnp
from jax.experimental import pallas as pl
from jax.experimental.pallas import tpu as pltpu


def _round_up(x, m):
    return ((x + m - 1) // m) * m


def _policy_kernel(s_ref, w1_ref, b1_ref, w2_ref, b2_ref, wm_ref, bm_ref,
                   scale_ref, bias_ref, o_ref):
    """Fused 3-layer MLP: (Linear+ReLU) x2 -> Linear -> tanh -> affine."""
    x = s_ref[...]                                   # f32 [TB, num_inputs]

    # layer 1: relu(x @ W1 + b1)  -- f32 operands (K is tiny; keeps input precision)
    h1 = jnp.dot(x, w1_ref[...], preferred_element_type=jnp.float32) + b1_ref[...]
    h1 = jnp.maximum(h1, 0.0)

    # layer 2: relu(h1 @ W2 + b2) -- bf16 operands, f32 MXU accumulation
    h2 = jnp.dot(h1.astype(jnp.bfloat16), w2_ref[...],
                 preferred_element_type=jnp.float32) + b2_ref[...]
    h2 = jnp.maximum(h2, 0.0)

    # mean head: tanh(h2 @ Wm + bm) * action_scale + action_bias
    m = jnp.dot(h2.astype(jnp.bfloat16), wm_ref[...],
                preferred_element_type=jnp.float32) + bm_ref[...]
    m = jnp.tanh(m) * scale_ref[...] + bias_ref[...]

    o_ref[...] = m.astype(o_ref.dtype)


def prepare_params(params, action_scale=1.0, action_bias=0.0):
    """One-time (out of the hot path) conversion of PyTorch-equivalent params.

    Returns (w1_f32, b1, w2_bf16, b2, wm_bf16, bm, scale, bias) ready for the kernel.
    action_scale / action_bias may be scalars or per-action vectors (Box spaces).
    """
    w1, b1, w2, b2, wm, bm = params
    hidden = w1.shape[1]
    num_actions = wm.shape[1]

    scale_v = jnp.broadcast_to(
        jnp.asarray(action_scale, jnp.float32), (num_actions,)).reshape(1, num_actions)
    bias_v = jnp.broadcast_to(
        jnp.asarray(action_bias, jnp.float32), (num_actions,)).reshape(1, num_actions)

    return (
        w1.astype(jnp.float32),                       # layer 1 stays f32
        b1.astype(jnp.float32).reshape(1, hidden),
        w2.astype(jnp.bfloat16),                      # MXU-native, halves weight DMA
        b2.astype(jnp.float32).reshape(1, hidden),
        wm.astype(jnp.bfloat16),
        bm.astype(jnp.float32).reshape(1, num_actions),
        scale_v,
        bias_v,
    )


def deterministic_policy_forward(state, prepared, block_b=1024):
    """state: [B, num_inputs] f32. Returns mean action: [B, num_actions] f32."""
    w1, b1, w2, b2, wm, bm, scale, bias = prepared
    B, num_inputs = state.shape
    num_actions = wm.shape[1]

    # Batch tile: multiple of 8; at most half the batch (rounded up) so the grid has
    # >= 2 steps whenever possible (feeds both v7x TensorCores); capped at block_b.
    TB = max(8, min(int(block_b), _round_up(pl.cdiv(B, 2), 8)))
    grid = (pl.cdiv(B, TB),)   # ragged last block: output writes are masked by Pallas

    # Weights / biases / scale / bias: full-array blocks, same block every grid step
    # (fetched once, held resident). State / output: batch-tiled, auto double-buffered.
    const2 = lambda a: pl.BlockSpec(a.shape, lambda i: (0, 0))

    out = pl.pallas_call(
        _policy_kernel,
        out_shape=jax.ShapeDtypeStruct((B, num_actions), jnp.float32),
        grid=grid,
        in_specs=[
            pl.BlockSpec((TB, num_inputs), lambda i: (i, 0)),   # state
            const2(w1), const2(b1),
            const2(w2), const2(b2),
            const2(wm), const2(bm),
            const2(scale), const2(bias),
        ],
        out_specs=pl.BlockSpec((TB, num_actions), lambda i: (i, 0)),
        compiler_params=pltpu.CompilerParams(
            dimension_semantics=("parallel",),   # shard batch grid across TCs on v7x
        ),
    )(state.astype(jnp.float32), w1, b1, w2, b2, wm, bm, scale, bias)

    return out


def init_params(key, num_inputs, num_actions, hidden_dim):
    """Xavier-uniform weights (gain=1), zero biases — mirrors weights_init_."""
    def xavier(k, fan_in, fan_out):
        limit = jnp.sqrt(6.0 / (fan_in + fan_out))
        # stored as [in, out] so the kernel computes x @ W (same math as x @ W_pt.T)
        return jax.random.uniform(k, (fan_in, fan_out), jnp.float32, -limit, limit)

    k1, k2, k3 = jax.random.split(key, 3)
    w1 = xavier(k1, num_inputs, hidden_dim)
    b1 = jnp.zeros((1, hidden_dim), jnp.float32)
    w2 = xavier(k2, hidden_dim, hidden_dim)
    b2 = jnp.zeros((1, hidden_dim), jnp.float32)
    wm = xavier(k3, hidden_dim, num_actions)
    bm = jnp.zeros((1, num_actions), jnp.float32)
    return (w1, b1, w2, b2, wm, bm)


def reference_forward_f32(state, params, action_scale=1.0, action_bias=0.0):
    """Pure-f32 reference (exact PyTorch math)."""
    w1, b1, w2, b2, wm, bm = params
    x = jnp.maximum(state @ w1 + b1, 0.0)
    x = jnp.maximum(x @ w2 + b2, 0.0)
    return jnp.tanh(x @ wm + bm) * jnp.asarray(action_scale, jnp.float32) \
        + jnp.asarray(action_bias, jnp.float32)


def reference_forward_mixed(state, params, action_scale=1.0, action_bias=0.0):
    """Reference with the same mixed-precision matmul math as the kernel
    (layer 1 f32, layers 2/3 bf16 operands with f32 accumulation)."""
    w1, b1, w2, b2, wm, bm = params
    bf = jnp.bfloat16
    h1 = jnp.maximum(jnp.dot(state, w1, preferred_element_type=jnp.float32) + b1, 0.0)
    h2 = jnp.maximum(jnp.dot(h1.astype(bf), w2.astype(bf),
                             preferred_element_type=jnp.float32) + b2, 0.0)
    m = jnp.dot(h2.astype(bf), wm.astype(bf),
                preferred_element_type=jnp.float32) + bm
    return jnp.tanh(m) * jnp.asarray(action_scale, jnp.float32) \
        + jnp.asarray(action_bias, jnp.float32)


if __name__ == "__main__":
    key = jax.random.PRNGKey(0)
    k_param, k_state, k_state2 = jax.random.split(key, 3)

    batch = 8
    num_inputs = 16
    num_actions = 4
    hidden_dim = 32

    params = init_params(k_param, num_inputs, num_actions, hidden_dim)
    state = jax.random.normal(k_state, (batch, num_inputs), jnp.float32)

    # --- case 1: action_space=None branch (scale=1.0, bias=0.0) ---
    prep1 = prepare_params(params, 1.0, 0.0)
    mean = jax.block_until_ready(deterministic_policy_forward(state, prep1))
    assert mean.shape == (batch, num_actions)
    ref_mx = reference_forward_mixed(state, params, 1.0, 0.0)
    ref_f32 = reference_forward_f32(state, params, 1.0, 0.0)
    assert jnp.allclose(mean, ref_mx, atol=1e-5, rtol=1e-5), "mismatch vs mixed-prec reference"
    assert jnp.allclose(mean, ref_f32, atol=3e-2, rtol=3e-2), "mismatch vs f32 reference"

    # --- case 2: per-action Box-space bounds: scale=(high-low)/2, bias=(high+low)/2 ---
    a_scale = jnp.array([1.0, 0.5, 2.0, 1.5], jnp.float32)
    a_bias = jnp.array([0.0, 0.1, -0.1, 0.2], jnp.float32)
    prep2 = prepare_params(params, a_scale, a_bias)
    mean2 = jax.block_until_ready(deterministic_policy_forward(state, prep2))
    ref2 = reference_forward_mixed(state, params, a_scale, a_bias)
    assert mean2.shape == (batch, num_actions)
    assert jnp.allclose(mean2, ref2, atol=1e-5, rtol=1e-5), "mismatch (vector bounds)"

    # --- case 3: ragged batch (grid = cdiv(B, TB), masked last block) ---
    batch3 = 37
    state3 = jax.random.normal(k_state2, (batch3, num_inputs), jnp.float32)
    mean3 = jax.block_until_ready(deterministic_policy_forward(state3, prep1))
    ref3 = reference_forward_mixed(state3, params, 1.0, 0.0)
    assert mean3.shape == (batch3, num_actions)
    assert jnp.allclose(mean3, ref3, atol=1e-5, rtol=1e-5), "mismatch (ragged batch)"

    # TODO(synk): `sample()` uses torch Tensor.normal_ in-place RNG; not part of
    # forward(), so only the deterministic forward pass is implemented here.

    print("KERNEL_OK")
</pallas_src>

<mosaic_0001>
module attributes {stable_mosaic.version = 11 : i64} {
  func.func @_policy_kernel(%arg0: i32, %arg1: memref<8x16xf32, #tpu.memory_space<vmem>>, %arg2: memref<16x32xf32, #tpu.memory_space<vmem>>, %arg3: memref<1x32xf32, #tpu.memory_space<vmem>>, %arg4: memref<32x32xbf16, #tpu.memory_space<vmem>>, %arg5: memref<1x32xf32, #tpu.memory_space<vmem>>, %arg6: memref<32x4xbf16, #tpu.memory_space<vmem>>, %arg7: memref<1x4xf32, #tpu.memory_space<vmem>>, %arg8: memref<1x4xf32, #tpu.memory_space<vmem>>, %arg9: memref<1x4xf32, #tpu.memory_space<vmem>>, %arg10: memref<8x4xf32, #tpu.memory_space<vmem>>) attributes {dimension_semantics = [#tpu.dimension_semantics<parallel>], iteration_bounds = array<i64: 1>, scalar_prefetch = 0 : i64, scratch_operands = 0 : i64, tpu.core_type = #tpu.core_type<tc>, window_params = [{transform_indices = @transform_0, window_bounds = array<i64: 8, 16>}, {pipeline_mode = #tpu.pipeline_mode<synchronous>, transform_indices = @transform_1, window_bounds = array<i64: 16, 32>}, {pipeline_mode = #tpu.pipeline_mode<synchronous>, transform_indices = @transform_2, window_bounds = array<i64: 1, 32>}, {pipeline_mode = #tpu.pipeline_mode<synchronous>, transform_indices = @transform_3, window_bounds = array<i64: 32, 32>}, {pipeline_mode = #tpu.pipeline_mode<synchronous>, transform_indices = @transform_4, window_bounds = array<i64: 1, 32>}, {pipeline_mode = #tpu.pipeline_mode<synchronous>, transform_indices = @transform_5, window_bounds = array<i64: 32, 4>}, {pipeline_mode = #tpu.pipeline_mode<synchronous>, transform_indices = @transform_6, window_bounds = array<i64: 1, 4>}, {pipeline_mode = #tpu.pipeline_mode<synchronous>, transform_indices = @transform_7, window_bounds = array<i64: 1, 4>}, {pipeline_mode = #tpu.pipeline_mode<synchronous>, transform_indices = @transform_8, window_bounds = array<i64: 1, 4>}, {transform_indices = @transform_9, window_bounds = array<i64: 8, 4>}]} {
    %c0 = arith.constant 0 : index
    %c0_0 = arith.constant 0 : index
    %0 = vector.load %arg1[%c0, %c0_0] : memref<8x16xf32, #tpu.memory_space<vmem>>, vector<8x16xf32>
    %c0_1 = arith.constant 0 : index
    %c0_2 = arith.constant 0 : index
    %1 = vector.load %arg2[%c0_1, %c0_2] : memref<16x32xf32, #tpu.memory_space<vmem>>, vector<16x32xf32>
    %cst = arith.constant dense<0.000000e+00> : vector<8x32xf32>
    %2 = tpu.matmul %0, %1, %cst {dimension_numbers = #tpu.dot_dimension_numbers<[1], [0], [0], [1], [0, 0, 1, 1], [], []>} : vector<8x16xf32>, vector<16x32xf32>, vector<8x32xf32> -> vector<8x32xf32>
    %c0_3 = arith.constant 0 : index
    %c0_4 = arith.constant 0 : index
    %3 = vector.load %arg3[%c0_3, %c0_4] : memref<1x32xf32, #tpu.memory_space<vmem>>, vector<1x32xf32>
    %4 = vector.broadcast %3 : vector<1x32xf32> to vector<8x32xf32>
    %5 = arith.addf %2, %4 : vector<8x32xf32>
    %cst_5 = arith.constant 0.000000e+00 : f32
    %6 = vector.broadcast %cst_5 : f32 to vector<8x32xf32>
    %7 = arith.maximumf %5, %6 : vector<8x32xf32>
    %8 = arith.truncf %7 : vector<8x32xf32> to vector<8x32xbf16>
    %c0_6 = arith.constant 0 : index
    %c0_7 = arith.constant 0 : index
    %9 = vector.load %arg4[%c0_6, %c0_7] : memref<32x32xbf16, #tpu.memory_space<vmem>>, vector<32x32xbf16>
    %cst_8 = arith.constant dense<0.000000e+00> : vector<8x32xf32>
    %10 = tpu.matmul %8, %9, %cst_8 {dimension_numbers = #tpu.dot_dimension_numbers<[1], [0], [0], [1], [0, 0, 1, 1], [], []>} : vector<8x32xbf16>, vector<32x32xbf16>, vector<8x32xf32> -> vector<8x32xf32>
    %c0_9 = arith.constant 0 : index
    %c0_10 = arith.constant 0 : index
    %11 = vector.load %arg5[%c0_9, %c0_10] : memref<1x32xf32, #tpu.memory_space<vmem>>, vector<1x32xf32>
    %12 = vector.broadcast %11 : vector<1x32xf32> to vector<8x32xf32>
    %13 = arith.addf %10, %12 : vector<8x32xf32>
    %cst_11 = arith.constant 0.000000e+00 : f32
    %14 = vector.broadcast %cst_11 : f32 to vector<8x32xf32>
    %15 = arith.maximumf %13, %14 : vector<8x32xf32>
    %16 = arith.truncf %15 : vector<8x32xf32> to vector<8x32xbf16>
    %c0_12 = arith.constant 0 : index
    %c0_13 = arith.constant 0 : index
    %17 = vector.load %arg6[%c0_12, %c0_13] : memref<32x4xbf16, #tpu.memory_space<vmem>>, vector<32x4xbf16>
    %cst_14 = arith.constant dense<0.000000e+00> : vector<8x4xf32>
    %18 = tpu.matmul %16, %17, %cst_14 {dimension_numbers = #tpu.dot_dimension_numbers<[1], [0], [0], [1], [0, 0, 1, 1], [], []>} : vector<8x32xbf16>, vector<32x4xbf16>, vector<8x4xf32> -> vector<8x4xf32>
    %c0_15 = arith.constant 0 : index
    %c0_16 = arith.constant 0 : index
    %19 = vector.load %arg7[%c0_15, %c0_16] : memref<1x4xf32, #tpu.memory_space<vmem>>, vector<1x4xf32>
    %20 = vector.broadcast %19 : vector<1x4xf32> to vector<8x4xf32>
    %21 = arith.addf %18, %20 : vector<8x4xf32>
    %22 = math.tanh %21 : vector<8x4xf32>
    %c0_17 = arith.constant 0 : index
    %c0_18 = arith.constant 0 : index
    %23 = vector.load %arg8[%c0_17, %c0_18] : memref<1x4xf32, #tpu.memory_space<vmem>>, vector<1x4xf32>
    %24 = vector.broadcast %23 : vector<1x4xf32> to vector<8x4xf32>
    %25 = arith.mulf %22, %24 : vector<8x4xf32>
    %c0_19 = arith.constant 0 : index
    %c0_20 = arith.constant 0 : index
    %26 = vector.load %arg9[%c0_19, %c0_20] : memref<1x4xf32, #tpu.memory_space<vmem>>, vector<1x4xf32>
    %27 = vector.broadcast %26 : vector<1x4xf32> to vector<8x4xf32>
    %28 = arith.addf %25, %27 : vector<8x4xf32>
    %c0_21 = arith.constant 0 : index
    %c0_22 = arith.constant 0 : index
    %29 = vector.load %arg10[%c0_21, %c0_22] : memref<8x4xf32, #tpu.memory_space<vmem>>, vector<8x4xf32>
    tpu.vector_store %arg10[%c0_21, %c0_22], %28 {strides = array<i32>} : memref<8x4xf32, #tpu.memory_space<vmem>>, vector<8x4xf32>,
    return
  }
  func.func @transform_0(%arg0: i32) -> (i32, i32) {
    %c0_i32 = arith.constant 0 : i32
    %c0_i32_0 = arith.constant 0 : i32
    return %arg0, %c0_i32 : i32, i32
  }
  func.func @transform_1(%arg0: i32) -> (i32, i32) {
    %c0_i32 = arith.constant 0 : i32
    %c0_i32_0 = arith.constant 0 : i32
    %c0_i32_1 = arith.constant 0 : i32
    return %c0_i32, %c0_i32_0 : i32, i32
  }
  func.func @transform_2(%arg0: i32) -> (i32, i32) {
    %c0_i32 = arith.constant 0 : i32
    %c0_i32_0 = arith.constant 0 : i32
    %c0_i32_1 = arith.constant 0 : i32
    return %c0_i32, %c0_i32_0 : i32, i32
  }
  func.func @transform_3(%arg0: i32) -> (i32, i32) {
    %c0_i32 = arith.constant 0 : i32
    %c0_i32_0 = arith.constant 0 : i32
    %c0_i32_1 = arith.constant 0 : i32
    return %c0_i32, %c0_i32_0 : i32, i32
  }
  func.func @transform_4(%arg0: i32) -> (i32, i32) {
    %c0_i32 = arith.constant 0 : i32
    %c0_i32_0 = arith.constant 0 : i32
    %c0_i32_1 = arith.constant 0 : i32
    return %c0_i32, %c0_i32_0 : i32, i32
  }
  func.func @transform_5(%arg0: i32) -> (i32, i32) {
    %c0_i32 = arith.constant 0 : i32
    %c0_i32_0 = arith.constant 0 : i32
    %c0_i32_1 = arith.constant 0 : i32
    return %c0_i32, %c0_i32_0 : i32, i32
  }
  func.func @transform_6(%arg0: i32) -> (i32, i32) {
    %c0_i32 = arith.constant 0 : i32
    %c0_i32_0 = arith.constant 0 : i32
    %c0_i32_1 = arith.constant 0 : i32
    return %c0_i32, %c0_i32_0 : i32, i32
  }
  func.func @transform_7(%arg0: i32) -> (i32, i32) {
    %c0_i32 = arith.constant 0 : i32
    %c0_i32_0 = arith.constant 0 : i32
    %c0_i32_1 = arith.constant 0 : i32
    return %c0_i32, %c0_i32_0 : i32, i32
  }
  func.func @transform_8(%arg0: i32) -> (i32, i32) {
    %c0_i32 = arith.constant 0 : i32
    %c0_i32_0 = arith.constant 0 : i32
    %c0_i32_1 = arith.constant 0 : i32
    return %c0_i32, %c0_i32_0 : i32, i32
  }
  func.func @transform_9(%arg0: i32) -> (i32, i32) {
    %c0_i32 = arith.constant 0 : i32
    %c0_i32_0 = arith.constant 0 : i32
    return %arg0, %c0_i32 : i32, i32
  }
}

</mosaic_0001>

<bundles_post_ra>
// kernel: tpu_custom_call.1
= control target key start
LH: loop header
LB: loop body
LE: loop exit
PB: predicated region body
PF: predicated region fallthrough
CT: control target
= control target key end

     0   :  { %14 = vsyncpa [#allocation3], 0  ;;  %s499_s0 = inlined_call_operand.hbm [shape: f32[8,16], index: 0, kind: input, shape index: {}]   ;;  %s500_s1 = inlined_call_operand.vmem [shape: f32[16,32], index: 1, kind: input, shape index: {}]   ;;  %s501_s2 = inlined_call_operand.vmem [shape: f32[1,32], index: 2, kind: input, shape index: {}]   ;;  %s502_s3 = inlined_call_operand.hbm [shape: bf16[32,32], index: 3, kind: input, shape index: {}]   ;;  %s503_s4 = inlined_call_operand.vmem [shape: f32[1,32], index: 4, kind: input, shape index: {}]   ;;  %s504_s5 = inlined_call_operand.vmem [shape: bf16[32,4], index: 5, kind: input, shape index: {}]   ;;  %s505_s6 = inlined_call_operand.vmem [shape: f32[1,4], index: 6, kind: input, shape index: {}]   ;;  %s506_s7 = inlined_call_operand.vmem [shape: f32[1,4], index: 7, kind: input, shape index: {}]   ;;  %s507_s8 = inlined_call_operand.vmem [shape: f32[1,4], index: 8, kind: input, shape index: {}]   ;;  %s508_s9 = inlined_call_operand.vmem [shape: f32[8,4], index: 9, kind: output, shape index: {}]  }
   0x1   :  { %15 = vsyncpa [#allocation5], 0  ;;  %s405_s30 = smov [#allocation2]   ;;  %s406_s11 = smov [#allocation4]  }
   0x2   :  { %s22_s10 = sshll.u32 %s405_s30, 4  ;;  %s35_s12 = sshll.u32 %s406_s11, 4  ;;  %s23_s10 = int_to_ptr.vmem [resolvable:$true] %s22_s10  ;;  %s36_s12 = int_to_ptr.vmem [resolvable:$true] %s35_s12 }
   0x3   :  { %s369_s13 = scalar_lea.vmem %s23_s10, 128  ;;  %p374_p1 = scmp.lt.s32.totalorder %s23_s10, %s23_s10 }
   0x4   :  { %p370_p0 = scmp.ne.s32.totalorder %s23_s10, %s369_s13  ;;  %p375_p2 = scmp.lt.s32.totalorder %s369_s13, %s369_s13 }
   0x6   :  { %p376_p3 = por %p375_p2, %p374_p1 }
   0x8   :  { %p377_p4 = pnand %p376_p3, %p370_p0 }
   0xa   :  { %380 = shalt.err (!%p377_p4)
}
   0xb   :  { %25 = dma.hbm_to_vmem [thread:$0]  %s499_s0, 128, %s23_s10, [#allocation3]  }
   0xc   :  { %s389_s16 = scalar_lea.vmem %s36_s12, 256  ;;  %p394_p6 = scmp.lt.s32.totalorder %s36_s12, %s36_s12 }
   0xd   :  { %p390_p5 = scmp.ne.s32.totalorder %s36_s12, %s389_s16  ;;  %p395_p7 = scmp.lt.s32.totalorder %s389_s16, %s389_s16 }
   0xf   :  { %p396_p8 = por %p395_p7, %p394_p6 }
  0x11   :  { %p397_p9 = pnand %p396_p8, %p390_p5 }
  0x13   :  { %400 = shalt.err (!%p397_p9)
}
  0x14   :  { %s407_s17 = smov 64   ;;  %s408_s18 = smov 4  }
  0x15   :  { %41 = dma.hbm_to_vmem [thread:$0]  %s502_s3, 256, %s36_s12, [#allocation5], %s407_s17, %s407_s17, %s408_s18  }
  0x16   :  { %401 = dma.done.wait [#allocation3], 128  }
  0x17   :  { %402 = vsyncadd [#allocation3], 4294967168 }
  0x18   :  { %403 = dma.done.wait [#allocation5], 256  }
  0x19   :  { %404 = vsyncadd [#allocation5], 4294967040  ;;  %v409_v0 = vmov 0.0   ;;  %vm410_vm0 = vmmov 0   ;;  %v61_v1 = vld [vmem:[%s500_s1 + $0x8] sm:$0xff]  ;;  %v60_v2 = vld [vmem:[%s500_s1] sm:$0xff] }
  0x1a   :  { %326 = vmatprep.subr.mxu0 %v409_v0  ;;  %330 = vmatprep.mubr.msk.f32.mxu0 %vm410_vm0, %v409_v0  ;;  %v59_v3 = vld [vmem:[#allocation2] sm:$0xff]  ;;  %vm69_vm1 = vcmask 130048   ;;  %v355_v4 = vld [vmem:[#allocation4 + $0x8] sm:$0xff]   ;;  %v356_v5 = vld [vmem:[#allocation4] sm:$0xff]   ;;  %vm168_vm2 = vcmask 261120   ;;  %vm297_vm3 = vcmask 31744  }
  0x1b   :  { %333 = vmatprep.subr.bf16.mxu1 %v409_v0  ;;  %337 = vmatprep.mubr.msk.bf16.mxu1 %vm410_vm0, %v409_v0  ;;  %v305_v6 = vld [vmem:[%s501_s2] ss:$0 sm:$0xff]  ;;  %v357_v12 = vld [vmem:[%s504_s5 + $0x8] sm:$0xff]  }
  0x1c   :  { %327 = vmatpush3.msra.mxu0 %v61_v1  ;;  %334 = vmatpush3.bf16.msra.mxu1 %v355_v4  ;;  %v358_v13 = vld [vmem:[%s504_s5] sm:$0xff]  }
  0x1d   :  { %328 = vmatprep.subr.mxu0 %v409_v0  ;;  %335 = vmatprep.subr.bf16.mxu1 %v409_v0  ;;  %v307_v14 = vld [vmem:[%s503_s4] ss:$0 sm:$0xff] }
  0x1e   :  { %329 = vmatpush3.msra.mxu0 %v60_v2  ;;  %v311_v22 = vld [vmem:[%s505_s6] ss:$0 sm:$0xff] }
  0x1f   :  { %331 = vmatmul.mubr.msk.f32.vlgmr.msra.gmra.mxu0 %vm69_vm1, %v59_v3  ;;  %341 = vmatprep.subr.bf16.mxu0 %v409_v0  ;;  %v315_v28 = vld [vmem:[%s506_s7] ss:$0 sm:$0xff] }
  0x20   :  { %345 = vmatprep.mubr.msk.bf16.mxu0 %vm410_vm0, %v409_v0  ;;  %336 = vmatpush3.bf16.msra.mxu1 %v356_v5  ;;  %v316_v30 = vld [vmem:[%s507_s8] ss:$0 sm:$0xff] }
  0x21   :  { %342 = vmatpush3.bf16.msra.mxu0 %v357_v12 }
  0x22   :  { %343 = vmatprep.subr.bf16.mxu0 %v409_v0 }
  0x25   :  { %344 = vmatpush3.bf16.msra.mxu0 %v358_v13 }
  0xdf   :  { %v139_v7 = vpop.f32.mrf.mxu0 }
  0xe0   :  { %v140_v8 = vadd.f32 %v305_v6, %v139_v7 }
  0xe1   :  { %v332_v9 = vpop.f32.mrf.mxu0 }
  0xe2   :  { %v143_v10 = vmax.f32 %v140_v8, 0.0 }
  0xe4   :  { %v144_v11 = vpack.c.bf16 %v143_v10, %v143_v10 }
  0xe6   :  { %338 = vmatmul.mubr.msk.bf16.vlgmr.msra.gmra.mxu1 %vm168_vm2, %v144_v11 }
 0x1a6   :  { %v206_v15 = vpop.f32.mrf.mxu1 }
 0x1a7   :  { %v207_v16 = vadd.f32 %v307_v14, %v206_v15 }
 0x1a8   :  { %v339_v17 = vpop.f32.mrf.mxu1 }
 0x1a9   :  { %v212_v18 = vmax.f32 %v207_v16, 0.0 }
 0x1aa   :  { %v209_v19 = vpop.f32.mrf.mxu1 }
 0x1ab   :  { %v213_v20 = vpack.c.bf16 %v212_v18, %v212_v18 }
 0x1ac   :  { %v340_v21 = vpop.f32.mrf.mxu1 }
 0x1ad   :  { %346 = vmatmul.mubr.msk.bf16.vlgmr.msra.gmra.mxu0 %vm168_vm2, %v213_v20 }
 0x26d   :  { %v274_v23 = vpop.f32.mrf.mxu0 }
 0x26e   :  { %v275_v24 = vadd.f32 %v311_v22, %v274_v23 }
 0x26f   :  { %v347_v25 = vpop.f32.mrf.mxu0 }
 0x270   :  { %359 = vtanh.f32 %v275_v24 }
 0x271   :  { %v277_v26 = vpop.f32.mrf.mxu0 }
 0x273   :  { %v348_v27 = vpop.f32.mrf.mxu0 }
 0x27d   :  { %v360_v29 = vpop.eup %359 }
 0x27e   :  { %v288_v31 = vmul.f32 %v360_v29, %v315_v28 }
 0x280   :  { %v296_v32 = vadd.f32 %v316_v30, %v288_v31 }
 0x282   :  { %298 = vst.msk [vmem:[%s508_s9] sm:$0xff] %vm297_vm3, %v296_v32 }
 0x283   :  { %303 = vsyncpa [#allocation3], 1 }
 0x284   :  { %304 = vsyncpa [#allocation5], 1 }

</bundles_post_ra>
